<compile_context>
chip_gen: v7x
topology: tpu7x:2x2x1
jax: 0.10.0
libtpu: 0.0.40
codegen_flags: <defaults>
</compile_context>

<pallas_src>
import functools

import jax
import jax.numpy as jnp
from jax import lax
from jax.experimental import pallas as pl
from jax.experimental.pallas import tpu as pltpu

NUM_OPS = 4
BN_EPS = 1e-5


def _mixed_up_kernel(w_ref, x_ref, w3_ref, w5_ref, o_ref, *, L, TC):
  """One output-channel tile of MixedUP.

  w_ref : (4,)          f32 SMEM  architecture weights [conv3, conv5, up, pool]
  x_ref : (C, N*L)      f32 VMEM  input, channel-major, batch folded into lanes
  w3_ref: (5, TC, C)    f32 VMEM  conv3 weights zero-padded to 5 taps
  w5_ref: (5, TC, C)    f32 VMEM  conv5 weights
  o_ref : (2, TC, N*L)  f32 VMEM  o_ref[r, c, n*L + u] == out[n, c, 2*u + r]
  """
  f32 = jnp.float32
  C_in, NL = x_ref.shape
  i = pl.program_id(0)

  a0 = w_ref[0]   # conv3 branch weight
  a1 = w_ref[1]   # conv5 branch weight
  a2 = w_ref[2]   # nearest-upsample branch weight
  a3 = w_ref[3]   # avgpool + BN branch weight

  # Fused effective conv taps V_d (d = j - 2): a1*W5_d + a0*W3_d (W3 pre-padded
  # with zero taps at d = -2 and d = +2 by the wrapper).  Tiny VPU work.
  v = a1 * w5_ref[...] + a0 * w3_ref[...]                  # (5, TC, C_in)

  xb = x_ref[...].astype(jnp.bfloat16)                     # (C_in, NL)

  # Channel mixing BEFORE upsampling: bf16 MXU matmul(s), f32 accumulation.
  if TC % 8 == 0:
    # Stack all 5 taps into one matmul (bigger M, fewer MXU issues).
    y_all = jnp.dot(v.reshape(5 * TC, C_in).astype(jnp.bfloat16), xb,
                    preferred_element_type=f32)            # (5*TC, NL)
    y = [y_all[j * TC:(j + 1) * TC, :] for j in range(5)]
  else:
    y = [jnp.dot(v[j].astype(jnp.bfloat16), xb, preferred_element_type=f32)
         for j in range(5)]

  # In-sample position u = p % L along the folded (n*L + u) lane axis.
  u_idx = lax.broadcasted_iota(jnp.int32, (1, NL), 1) % L

  def shift(a, d):
    # out[:, p] = a[:, p + d] if 0 <= (p % L) + d < L else 0   (d in {-1, +1}).
    # Circular pltpu.roll; wrapped lanes (sample boundaries / array ends) are
    # masked back to zero to preserve the zero-padding semantics.
    rolled = pltpu.roll(a, (-d) % NL, 1)
    src = u_idx + d
    return jnp.where((src >= 0) & (src < L), rolled, 0.0)

  # Fused conv3+conv5 on the upsampled signal, parity-decomposed.
  conv_even = shift(y[0] + y[1], -1) + (y[2] + y[3]) + shift(y[4], 1)
  conv_odd = shift(y[0], -1) + (y[1] + y[2]) + shift(y[3] + y[4], 1)

  # Identity / pool / BN branches only touch this tile's own channels.
  row0 = i * TC
  if TC % 8 == 0:
    row0 = pl.multiple_of(row0, 8)
  xt = x_ref[pl.ds(row0, TC), :]                           # (TC, NL) f32

  # AvgPool1d(3, stride=1, pad=1) of nearest-x2(x), per output parity:
  #   pool[2u] = (x[u-1] + 2 x[u]) / 3 ,  pool[2u+1] = (2 x[u] + x[u+1]) / 3
  pool_even = (shift(xt, -1) + 2.0 * xt) * (1.0 / 3.0)
  pool_odd = (2.0 * xt + shift(xt, 1)) * (1.0 / 3.0)

  # BatchNorm1d(C, affine=False): training-mode batch stats over (N, 2L) per
  # channel, one pass (sum and sum of squares over both parities).
  # TODO(synk): eval-mode running statistics are not modeled.
  cnt = f32(2 * NL)
  s1 = (jnp.sum(pool_even, axis=1, keepdims=True)
        + jnp.sum(pool_odd, axis=1, keepdims=True))
  s2 = (jnp.sum(pool_even * pool_even, axis=1, keepdims=True)
        + jnp.sum(pool_odd * pool_odd, axis=1, keepdims=True))
  mean = s1 / cnt
  var = s2 / cnt - mean * mean
  inv_std = lax.rsqrt(var + BN_EPS)

  out_even = conv_even + a2 * xt + a3 * ((pool_even - mean) * inv_std)
  out_odd = conv_odd + a2 * xt + a3 * ((pool_odd - mean) * inv_std)

  o_ref[0] = out_even.astype(o_ref.dtype)
  o_ref[1] = out_odd.astype(o_ref.dtype)


@jax.jit
def mixed_up(x, weights, w_conv3, w_conv5):
  """MixedUP forward.

  x:        (N, C, L)  float32
  weights:  (NUM_OPS,) float32 architecture weights
  w_conv3:  (3, C, C)  float32 tap-major Conv1d weights (w[j][out_c, in_c])
  w_conv5:  (5, C, C)  float32
  returns:  (N, C, 2*L) float32
  """
  N, C, L = x.shape
  NL = N * L

  # Output-channel tile (8-sublane aligned).  BN is per-channel so channel
  # tiling keeps the batch statistics exact; grid axis is megacore-parallel.
  # TODO(synk): for very large C a bigger channel tile would reduce per-step
  # grid overhead; 8 keeps the demo grid non-trivial.
  TC = 8 if C % 8 == 0 else C
  grid = (C // TC,)

  # XLA-side layout plumbing: channel-major input with N folded into the lane
  # axis; conv3 zero-padded to 5 taps so it fuses into conv5 inside the kernel.
  xt = jnp.transpose(x, (1, 0, 2)).reshape(C, NL)
  w3p = jnp.pad(w_conv3, ((1, 1), (0, 0), (0, 0)))

  kernel = functools.partial(_mixed_up_kernel, L=L, TC=TC)

  out2 = pl.pallas_call(
      kernel,
      out_shape=jax.ShapeDtypeStruct((2, C, NL), jnp.float32),
      grid=grid,
      in_specs=[
          pl.BlockSpec(memory_space=pltpu.MemorySpace.SMEM),    # arch weights
          pl.BlockSpec((C, NL), lambda i: (0, 0)),              # x (resident)
          pl.BlockSpec((5, TC, C), lambda i: (0, i, 0)),        # conv3 padded
          pl.BlockSpec((5, TC, C), lambda i: (0, i, 0)),        # conv5
      ],
      out_specs=pl.BlockSpec((2, TC, NL), lambda i: (0, i, 0)),
      compiler_params=pltpu.CompilerParams(
          dimension_semantics=("parallel",)),
  )(weights, xt, w3p, w_conv5)

  # Interleave the even/odd streams back to (N, C, 2L): out[n, c, 2u+r].
  return jnp.transpose(out2.reshape(2, C, N, L), (2, 1, 3, 0)).reshape(
      N, C, 2 * L)


def _reference(x, weights, w_conv3, w_conv5):
  """Pure-JAX reference of the same forward pass (for a sanity check)."""
  N, C, L = x.shape
  T = 2 * L
  hi = jax.lax.Precision.HIGHEST
  x_up = jnp.repeat(x, 2, axis=-1)

  def conv(W):
    k = W.shape[0]
    pad = k // 2
    xp = jnp.pad(x_up, ((0, 0), (0, 0), (pad, pad)))
    return sum(jnp.einsum('oi,nit->not', W[j], xp[:, :, j:j + T],
                          precision=hi) for j in range(k))

  conv3 = conv(w_conv3)
  conv5 = conv(w_conv5)
  xp = jnp.pad(x_up, ((0, 0), (0, 0), (1, 1)))
  pool = (xp[:, :, 0:T] + xp[:, :, 1:T + 1] + xp[:, :, 2:T + 2]) / 3.0
  mean = pool.mean(axis=(0, 2), keepdims=True)
  var = ((pool - mean) ** 2).mean(axis=(0, 2), keepdims=True)
  bn = (pool - mean) / jnp.sqrt(var + BN_EPS)
  return (weights[0] * conv3 + weights[1] * conv5
          + weights[2] * x_up + weights[3] * bn)


if __name__ == "__main__":
  # Small shapes: 2 channel tiles on the grid, N*L = 128 lanes, T = 2L = 128.
  N, C, L = 2, 16, 64
  key = jax.random.PRNGKey(0)
  kx, kw, k3, k5 = jax.random.split(key, 4)
  x = jax.random.normal(kx, (N, C, L), jnp.float32)
  weights = jax.nn.softmax(jax.random.normal(kw, (NUM_OPS,), jnp.float32))
  w_conv3 = 0.1 * jax.random.normal(k3, (3, C, C), jnp.float32)
  w_conv5 = 0.1 * jax.random.normal(k5, (5, C, C), jnp.float32)

  out = mixed_up(x, weights, w_conv3, w_conv5)
  jax.block_until_ready(out)

  ref = _reference(x, weights, w_conv3, w_conv5)
  assert out.shape == (N, C, 2 * L)
  err = float(jnp.max(jnp.abs(out - ref)))
  # Conv path uses bf16 MXU inputs (f32 accumulation) -> slightly looser tol.
  assert bool(jnp.allclose(out, ref, rtol=1e-2, atol=1e-2)), (
      "max abs err = %g" % err)
  print("KERNEL_OK")
</pallas_src>

<mosaic_0001>
module attributes {stable_mosaic.version = 11 : i64} {
  func.func @_mixed_up_kernel(%arg0: i32, %arg1: memref<4xf32, #tpu.memory_space<smem>>, %arg2: memref<16x128xf32, #tpu.memory_space<vmem>>, %arg3: memref<5x8x16xf32, #tpu.memory_space<vmem>>, %arg4: memref<5x8x16xf32, #tpu.memory_space<vmem>>, %arg5: memref<2x8x128xf32, #tpu.memory_space<vmem>>) attributes {dimension_semantics = [#tpu.dimension_semantics<parallel>], iteration_bounds = array<i64: 2>, scalar_prefetch = 0 : i64, scratch_operands = 0 : i64, tpu.core_type = #tpu.core_type<tc>, window_params = [{transform_indices = @transform_0, window_bounds = array<i64: 4>}, {pipeline_mode = #tpu.pipeline_mode<synchronous>, transform_indices = @transform_1, window_bounds = array<i64: 16, 128>}, {transform_indices = @transform_2, window_bounds = array<i64: 5, 8, 16>}, {transform_indices = @transform_3, window_bounds = array<i64: 5, 8, 16>}, {transform_indices = @transform_4, window_bounds = array<i64: 2, 8, 128>}]} {
    %c0 = arith.constant 0 : index
    %0 = memref.load %arg1[%c0] : memref<4xf32, #tpu.memory_space<smem>>
    %c1 = arith.constant 1 : index
    %1 = memref.load %arg1[%c1] : memref<4xf32, #tpu.memory_space<smem>>
    %c2 = arith.constant 2 : index
    %2 = memref.load %arg1[%c2] : memref<4xf32, #tpu.memory_space<smem>>
    %c3 = arith.constant 3 : index
    %3 = memref.load %arg1[%c3] : memref<4xf32, #tpu.memory_space<smem>>
    %c0_0 = arith.constant 0 : index
    %c0_1 = arith.constant 0 : index
    %c0_2 = arith.constant 0 : index
    %4 = vector.load %arg4[%c0_0, %c0_1, %c0_2] : memref<5x8x16xf32, #tpu.memory_space<vmem>>, vector<5x8x16xf32>
    %5 = vector.broadcast %1 : f32 to vector<5x8x16xf32>
    %6 = arith.mulf %5, %4 : vector<5x8x16xf32>
    %c0_3 = arith.constant 0 : index
    %c0_4 = arith.constant 0 : index
    %c0_5 = arith.constant 0 : index
    %7 = vector.load %arg3[%c0_3, %c0_4, %c0_5] : memref<5x8x16xf32, #tpu.memory_space<vmem>>, vector<5x8x16xf32>
    %8 = vector.broadcast %0 : f32 to vector<5x8x16xf32>
    %9 = arith.mulf %8, %7 : vector<5x8x16xf32>
    %10 = arith.addf %6, %9 : vector<5x8x16xf32>
    %c0_6 = arith.constant 0 : index
    %c0_7 = arith.constant 0 : index
    %11 = vector.load %arg2[%c0_6, %c0_7] : memref<16x128xf32, #tpu.memory_space<vmem>>, vector<16x128xf32>
    %12 = arith.truncf %11 : vector<16x128xf32> to vector<16x128xbf16>
    %13 = vector.shape_cast %10 : vector<5x8x16xf32> to vector<40x16xf32>
    %14 = arith.truncf %13 : vector<40x16xf32> to vector<40x16xbf16>
    %cst = arith.constant dense<0.000000e+00> : vector<40x128xf32>
    %15 = tpu.matmul %14, %12, %cst {dimension_numbers = #tpu.dot_dimension_numbers<[1], [0], [0], [1], [0, 0, 1, 1], [], []>} : vector<40x16xbf16>, vector<16x128xbf16>, vector<40x128xf32> -> vector<40x128xf32>
    %16 = vector.extract_strided_slice %15 {offsets = [0, 0], sizes = [8, 128], strides = [1, 1]} : vector<40x128xf32> to vector<8x128xf32>
    %17 = vector.extract_strided_slice %15 {offsets = [8, 0], sizes = [8, 128], strides = [1, 1]} : vector<40x128xf32> to vector<8x128xf32>
    %18 = vector.extract_strided_slice %15 {offsets = [16, 0], sizes = [8, 128], strides = [1, 1]} : vector<40x128xf32> to vector<8x128xf32>
    %19 = vector.extract_strided_slice %15 {offsets = [24, 0], sizes = [8, 128], strides = [1, 1]} : vector<40x128xf32> to vector<8x128xf32>
    %20 = vector.extract_strided_slice %15 {offsets = [32, 0], sizes = [8, 128], strides = [1, 1]} : vector<40x128xf32> to vector<8x128xf32>
    %21 = tpu.iota {dimensions = array<i32: 1>} : vector<1x128xi32>
    %c64_i32 = arith.constant 64 : i32
    %c0_i32 = arith.constant 0 : i32
    %22 = arith.cmpi eq, %c64_i32, %c0_i32 : i32
    %c1_i32 = arith.constant 1 : i32
    %23 = arith.select %22, %c1_i32, %c64_i32 : i32
    %24 = vector.broadcast %23 : i32 to vector<1x128xi32>
    %25 = arith.remsi %21, %24 : vector<1x128xi32>
    %c0_i32_8 = arith.constant 0 : i32
    %26 = vector.broadcast %c0_i32_8 : i32 to vector<1x128xi32>
    %27 = arith.cmpi ne, %25, %26 : vector<1x128xi32>
    %c0_i32_9 = arith.constant 0 : i32
    %28 = vector.broadcast %c0_i32_9 : i32 to vector<1x128xi32>
    %29 = arith.cmpi slt, %25, %28 : vector<1x128xi32>
    %c0_i32_10 = arith.constant 0 : i32
    %30 = arith.cmpi slt, %23, %c0_i32_10 : i32
    %31 = vector.broadcast %30 : i1 to vector<1x128xi1>
    %32 = vector.broadcast %31 : vector<1x128xi1> to vector<1x128xi1>
    %33 = arith.xori %29, %32 : vector<1x128xi1>
    %34 = arith.andi %33, %27 : vector<1x128xi1>
    %35 = vector.broadcast %23 : i32 to vector<1x128xi32>
    %36 = arith.addi %25, %35 : vector<1x128xi32>
    %37 = arith.select %34, %36, %25 : vector<1x128xi1>, vector<1x128xi32>
    %38 = arith.addf %16, %17 : vector<8x128xf32>
    %c1_i32_11 = arith.constant 1 : i32
    %39 = tpu.dynamic_rotate %38 by %c1_i32_11 dim 1 : vector<8x128xf32>, i32 -> vector<8x128xf32>
    %c-1_i32 = arith.constant -1 : i32
    %40 = vector.broadcast %c-1_i32 : i32 to vector<1x128xi32>
    %41 = arith.addi %37, %40 : vector<1x128xi32>
    %c0_i32_12 = arith.constant 0 : i32
    %42 = vector.broadcast %c0_i32_12 : i32 to vector<1x128xi32>
    %43 = arith.cmpi sge, %41, %42 : vector<1x128xi32>
    %c64_i32_13 = arith.constant 64 : i32
    %44 = vector.broadcast %c64_i32_13 : i32 to vector<1x128xi32>
    %45 = arith.cmpi slt, %41, %44 : vector<1x128xi32>
    %46 = arith.andi %43, %45 : vector<1x128xi1>
    %cst_14 = arith.constant 0.000000e+00 : f32
    %47 = vector.shape_cast %46 : vector<1x128xi1> to vector<1x128xi1>
    %48 = vector.broadcast %47 : vector<1x128xi1> to vector<8x128xi1>
    %49 = vector.broadcast %cst_14 : f32 to vector<8x128xf32>
    %50 = arith.select %48, %39, %49 : vector<8x128xi1>, vector<8x128xf32>
    %51 = arith.addf %18, %19 : vector<8x128xf32>
    %52 = arith.addf %50, %51 : vector<8x128xf32>
    %c127_i32 = arith.constant 127 : i32
    %53 = tpu.dynamic_rotate %20 by %c127_i32 dim 1 : vector<8x128xf32>, i32 -> vector<8x128xf32>
    %c1_i32_15 = arith.constant 1 : i32
    %54 = vector.broadcast %c1_i32_15 : i32 to vector<1x128xi32>
    %55 = arith.addi %37, %54 : vector<1x128xi32>
    %c0_i32_16 = arith.constant 0 : i32
    %56 = vector.broadcast %c0_i32_16 : i32 to vector<1x128xi32>
    %57 = arith.cmpi sge, %55, %56 : vector<1x128xi32>
    %c64_i32_17 = arith.constant 64 : i32
    %58 = vector.broadcast %c64_i32_17 : i32 to vector<1x128xi32>
    %59 = arith.cmpi slt, %55, %58 : vector<1x128xi32>
    %60 = arith.andi %57, %59 : vector<1x128xi1>
    %cst_18 = arith.constant 0.000000e+00 : f32
    %61 = vector.shape_cast %60 : vector<1x128xi1> to vector<1x128xi1>
    %62 = vector.broadcast %61 : vector<1x128xi1> to vector<8x128xi1>
    %63 = vector.broadcast %cst_18 : f32 to vector<8x128xf32>
    %64 = arith.select %62, %53, %63 : vector<8x128xi1>, vector<8x128xf32>
    %65 = arith.addf %52, %64 : vector<8x128xf32>
    %c1_i32_19 = arith.constant 1 : i32
    %66 = tpu.dynamic_rotate %16 by %c1_i32_19 dim 1 : vector<8x128xf32>, i32 -> vector<8x128xf32>
    %c-1_i32_20 = arith.constant -1 : i32
    %67 = vector.broadcast %c-1_i32_20 : i32 to vector<1x128xi32>
    %68 = arith.addi %37, %67 : vector<1x128xi32>
    %c0_i32_21 = arith.constant 0 : i32
    %69 = vector.broadcast %c0_i32_21 : i32 to vector<1x128xi32>
    %70 = arith.cmpi sge, %68, %69 : vector<1x128xi32>
    %c64_i32_22 = arith.constant 64 : i32
    %71 = vector.broadcast %c64_i32_22 : i32 to vector<1x128xi32>
    %72 = arith.cmpi slt, %68, %71 : vector<1x128xi32>
    %73 = arith.andi %70, %72 : vector<1x128xi1>
    %cst_23 = arith.constant 0.000000e+00 : f32
    %74 = vector.shape_cast %73 : vector<1x128xi1> to vector<1x128xi1>
    %75 = vector.broadcast %74 : vector<1x128xi1> to vector<8x128xi1>
    %76 = vector.broadcast %cst_23 : f32 to vector<8x128xf32>
    %77 = arith.select %75, %66, %76 : vector<8x128xi1>, vector<8x128xf32>
    %78 = arith.addf %17, %18 : vector<8x128xf32>
    %79 = arith.addf %77, %78 : vector<8x128xf32>
    %80 = arith.addf %19, %20 : vector<8x128xf32>
    %c127_i32_24 = arith.constant 127 : i32
    %81 = tpu.dynamic_rotate %80 by %c127_i32_24 dim 1 : vector<8x128xf32>, i32 -> vector<8x128xf32>
    %c1_i32_25 = arith.constant 1 : i32
    %82 = vector.broadcast %c1_i32_25 : i32 to vector<1x128xi32>
    %83 = arith.addi %37, %82 : vector<1x128xi32>
    %c0_i32_26 = arith.constant 0 : i32
    %84 = vector.broadcast %c0_i32_26 : i32 to vector<1x128xi32>
    %85 = arith.cmpi sge, %83, %84 : vector<1x128xi32>
    %c64_i32_27 = arith.constant 64 : i32
    %86 = vector.broadcast %c64_i32_27 : i32 to vector<1x128xi32>
    %87 = arith.cmpi slt, %83, %86 : vector<1x128xi32>
    %88 = arith.andi %85, %87 : vector<1x128xi1>
    %cst_28 = arith.constant 0.000000e+00 : f32
    %89 = vector.shape_cast %88 : vector<1x128xi1> to vector<1x128xi1>
    %90 = vector.broadcast %89 : vector<1x128xi1> to vector<8x128xi1>
    %91 = vector.broadcast %cst_28 : f32 to vector<8x128xf32>
    %92 = arith.select %90, %81, %91 : vector<8x128xi1>, vector<8x128xf32>
    %93 = arith.addf %79, %92 : vector<8x128xf32>
    %c8_i32 = arith.constant 8 : i32
    %94 = arith.muli %arg0, %c8_i32 : i32
    %95 = tpu.assume_multiple %94, 8 : i32
    %96 = arith.index_cast %95 : i32 to index
    %c0_29 = arith.constant 0 : index
    %97 = vector.load %arg2[%96, %c0_29] : memref<16x128xf32, #tpu.memory_space<vmem>>, vector<8x128xf32>
    %c1_i32_30 = arith.constant 1 : i32
    %98 = tpu.dynamic_rotate %97 by %c1_i32_30 dim 1 : vector<8x128xf32>, i32 -> vector<8x128xf32>
    %c-1_i32_31 = arith.constant -1 : i32
    %99 = vector.broadcast %c-1_i32_31 : i32 to vector<1x128xi32>
    %100 = arith.addi %37, %99 : vector<1x128xi32>
    %c0_i32_32 = arith.constant 0 : i32
    %101 = vector.broadcast %c0_i32_32 : i32 to vector<1x128xi32>
    %102 = arith.cmpi sge, %100, %101 : vector<1x128xi32>
    %c64_i32_33 = arith.constant 64 : i32
    %103 = vector.broadcast %c64_i32_33 : i32 to vector<1x128xi32>
    %104 = arith.cmpi slt, %100, %103 : vector<1x128xi32>
    %105 = arith.andi %102, %104 : vector<1x128xi1>
    %cst_34 = arith.constant 0.000000e+00 : f32
    %106 = vector.shape_cast %105 : vector<1x128xi1> to vector<1x128xi1>
    %107 = vector.broadcast %106 : vector<1x128xi1> to vector<8x128xi1>
    %108 = vector.broadcast %cst_34 : f32 to vector<8x128xf32>
    %109 = arith.select %107, %98, %108 : vector<8x128xi1>, vector<8x128xf32>
    %cst_35 = arith.constant 2.000000e+00 : f32
    %110 = vector.broadcast %cst_35 : f32 to vector<8x128xf32>
    %111 = arith.mulf %110, %97 : vector<8x128xf32>
    %112 = arith.addf %109, %111 : vector<8x128xf32>
    %cst_36 = arith.constant 0.333333343 : f32
    %113 = vector.broadcast %cst_36 : f32 to vector<8x128xf32>
    %114 = arith.mulf %112, %113 : vector<8x128xf32>
    %cst_37 = arith.constant 2.000000e+00 : f32
    %115 = vector.broadcast %cst_37 : f32 to vector<8x128xf32>
    %116 = arith.mulf %115, %97 : vector<8x128xf32>
    %c127_i32_38 = arith.constant 127 : i32
    %117 = tpu.dynamic_rotate %97 by %c127_i32_38 dim 1 : vector<8x128xf32>, i32 -> vector<8x128xf32>
    %c1_i32_39 = arith.constant 1 : i32
    %118 = vector.broadcast %c1_i32_39 : i32 to vector<1x128xi32>
    %119 = arith.addi %37, %118 : vector<1x128xi32>
    %c0_i32_40 = arith.constant 0 : i32
    %120 = vector.broadcast %c0_i32_40 : i32 to vector<1x128xi32>
    %121 = arith.cmpi sge, %119, %120 : vector<1x128xi32>
    %c64_i32_41 = arith.constant 64 : i32
    %122 = vector.broadcast %c64_i32_41 : i32 to vector<1x128xi32>
    %123 = arith.cmpi slt, %119, %122 : vector<1x128xi32>
    %124 = arith.andi %121, %123 : vector<1x128xi1>
    %cst_42 = arith.constant 0.000000e+00 : f32
    %125 = vector.shape_cast %124 : vector<1x128xi1> to vector<1x128xi1>
    %126 = vector.broadcast %125 : vector<1x128xi1> to vector<8x128xi1>
    %127 = vector.broadcast %cst_42 : f32 to vector<8x128xf32>
    %128 = arith.select %126, %117, %127 : vector<8x128xi1>, vector<8x128xf32>
    %129 = arith.addf %116, %128 : vector<8x128xf32>
    %cst_43 = arith.constant 0.333333343 : f32
    %130 = vector.broadcast %cst_43 : f32 to vector<8x128xf32>
    %131 = arith.mulf %129, %130 : vector<8x128xf32>
    %cst_44 = arith.constant dense<0.000000e+00> : vector<8xf32>
    %132 = vector.multi_reduction <add>, %114, %cst_44 [1] : vector<8x128xf32> to vector<8xf32>
    %133 = vector.shape_cast %132 : vector<8xf32> to vector<8x1xf32>
    %cst_45 = arith.constant dense<0.000000e+00> : vector<8xf32>
    %134 = vector.multi_reduction <add>, %131, %cst_45 [1] : vector<8x128xf32> to vector<8xf32>
    %135 = vector.shape_cast %134 : vector<8xf32> to vector<8x1xf32>
    %136 = arith.addf %133, %135 : vector<8x1xf32>
    %137 = arith.mulf %114, %114 : vector<8x128xf32>
    %cst_46 = arith.constant dense<0.000000e+00> : vector<8xf32>
    %138 = vector.multi_reduction <add>, %137, %cst_46 [1] : vector<8x128xf32> to vector<8xf32>
    %139 = vector.shape_cast %138 : vector<8xf32> to vector<8x1xf32>
    %140 = arith.mulf %131, %131 : vector<8x128xf32>
    %cst_47 = arith.constant dense<0.000000e+00> : vector<8xf32>
    %141 = vector.multi_reduction <add>, %140, %cst_47 [1] : vector<8x128xf32> to vector<8xf32>
    %142 = vector.shape_cast %141 : vector<8xf32> to vector<8x1xf32>
    %143 = arith.addf %139, %142 : vector<8x1xf32>
    %cst_48 = arith.constant 2.560000e+02 : f32
    %144 = vector.broadcast %cst_48 : f32 to vector<8x1xf32>
    %145 = arith.divf %136, %144 : vector<8x1xf32>
    %cst_49 = arith.constant 2.560000e+02 : f32
    %146 = vector.broadcast %cst_49 : f32 to vector<8x1xf32>
    %147 = arith.divf %143, %146 : vector<8x1xf32>
    %148 = arith.mulf %145, %145 : vector<8x1xf32>
    %149 = arith.subf %147, %148 : vector<8x1xf32>
    %cst_50 = arith.constant 9.99999974E-6 : f32
    %150 = vector.broadcast %cst_50 : f32 to vector<8x1xf32>
    %151 = arith.addf %149, %150 : vector<8x1xf32>
    %152 = math.rsqrt %151 : vector<8x1xf32>
    %153 = vector.broadcast %2 : f32 to vector<8x128xf32>
    %154 = arith.mulf %153, %97 : vector<8x128xf32>
    %155 = arith.addf %65, %154 : vector<8x128xf32>
    %156 = vector.broadcast %145 : vector<8x1xf32> to vector<8x128xf32>
    %157 = arith.subf %114, %156 : vector<8x128xf32>
    %158 = vector.broadcast %152 : vector<8x1xf32> to vector<8x128xf32>
    %159 = arith.mulf %157, %158 : vector<8x128xf32>
    %160 = vector.broadcast %3 : f32 to vector<8x128xf32>
    %161 = arith.mulf %160, %159 : vector<8x128xf32>
    %162 = arith.addf %155, %161 : vector<8x128xf32>
    %163 = vector.broadcast %2 : f32 to vector<8x128xf32>
    %164 = arith.mulf %163, %97 : vector<8x128xf32>
    %165 = arith.addf %93, %164 : vector<8x128xf32>
    %166 = vector.broadcast %145 : vector<8x1xf32> to vector<8x128xf32>
    %167 = arith.subf %131, %166 : vector<8x128xf32>
    %168 = vector.broadcast %152 : vector<8x1xf32> to vector<8x128xf32>
    %169 = arith.mulf %167, %168 : vector<8x128xf32>
    %170 = vector.broadcast %3 : f32 to vector<8x128xf32>
    %171 = arith.mulf %170, %169 : vector<8x128xf32>
    %172 = arith.addf %165, %171 : vector<8x128xf32>
    %c0_51 = arith.constant 0 : index
    %c0_52 = arith.constant 0 : index
    %c0_53 = arith.constant 0 : index
    %173 = vector.load %arg5[%c0_51, %c0_52, %c0_53] : memref<2x8x128xf32, #tpu.memory_space<vmem>>, vector<1x8x128xf32>
    %174 = vector.shape_cast %173 : vector<1x8x128xf32> to vector<8x128xf32>
    %175 = vector.shape_cast %162 : vector<8x128xf32> to vector<1x8x128xf32>
    tpu.vector_store %arg5[%c0_51, %c0_52, %c0_53], %175 {strides = array<i32>} : memref<2x8x128xf32, #tpu.memory_space<vmem>>, vector<1x8x128xf32>,
    %c1_54 = arith.constant 1 : index
    %c0_55 = arith.constant 0 : index
    %c0_56 = arith.constant 0 : index
    %176 = vector.load %arg5[%c1_54, %c0_55, %c0_56] : memref<2x8x128xf32, #tpu.memory_space<vmem>>, vector<1x8x128xf32>
    %177 = vector.shape_cast %176 : vector<1x8x128xf32> to vector<8x128xf32>
    %178 = vector.shape_cast %172 : vector<8x128xf32> to vector<1x8x128xf32>
    tpu.vector_store %arg5[%c1_54, %c0_55, %c0_56], %178 {strides = array<i32>} : memref<2x8x128xf32, #tpu.memory_space<vmem>>, vector<1x8x128xf32>,
    return
  }
  func.func @transform_0(%arg0: i32) -> i32 {
    %c0_i32 = arith.constant 0 : i32
    %c0_i32_0 = arith.constant 0 : i32
    return %c0_i32 : i32
  }
  func.func @transform_1(%arg0: i32) -> (i32, i32) {
    %c0_i32 = arith.constant 0 : i32
    %c0_i32_0 = arith.constant 0 : i32
    %c0_i32_1 = arith.constant 0 : i32
    return %c0_i32, %c0_i32_0 : i32, i32
  }
  func.func @transform_2(%arg0: i32) -> (i32, i32, i32) {
    %c0_i32 = arith.constant 0 : i32
    %c0_i32_0 = arith.constant 0 : i32
    %c0_i32_1 = arith.constant 0 : i32
    return %c0_i32, %arg0, %c0_i32_0 : i32, i32, i32
  }
  func.func @transform_3(%arg0: i32) -> (i32, i32, i32) {
    %c0_i32 = arith.constant 0 : i32
    %c0_i32_0 = arith.constant 0 : i32
    %c0_i32_1 = arith.constant 0 : i32
    return %c0_i32, %arg0, %c0_i32_0 : i32, i32, i32
  }
  func.func @transform_4(%arg0: i32) -> (i32, i32, i32) {
    %c0_i32 = arith.constant 0 : i32
    %c0_i32_0 = arith.constant 0 : i32
    %c0_i32_1 = arith.constant 0 : i32
    return %c0_i32, %arg0, %c0_i32_0 : i32, i32, i32
  }
}

</mosaic_0001>

<bundles_post_ra>
// kernel: mixed_up.1
= control target key start
LH: loop header
LB: loop body
LE: loop exit
PB: predicated region body
PF: predicated region fallthrough
CT: control target
= control target key end

     0   :  { %9 = vsyncpa [#allocation3], 0  ;;  %s817_s15 = smov 0   ;;  %s819_s16 = smov 0   ;;  %s972_s0 = inlined_call_operand.vmem [shape: f32[4], index: 0, kind: input, shape index: {}]   ;;  %s973_s1 = inlined_call_operand.vmem [shape: f32[16,128], index: 1, kind: input, shape index: {}]   ;;  %s974_s2 = inlined_call_operand.vmem [shape: f32[5,16,16], index: 2, kind: input, shape index: {}]   ;;  %s975_s3 = inlined_call_operand.vmem [shape: f32[5,16,16], index: 3, kind: input, shape index: {}]   ;;  %s976_s4 = inlined_call_operand.vmem [shape: f32[2,16,128], index: 4, kind: output, shape index: {}]  }
   0x1   :  { %s821_s17 = smov 0  }
   0x2 LB: > { %s833_s18 = sadd.s32 4294967295, %s785_s17   ;;  %s836_s19 = sadd.s32 1, %s785_s17   ;;  %s785_s17 = sphi %s821_s17, %s983_s17   ;;  %s781_s16 = sphi %s819_s16, %s982_s16   ;;  %s777_s15 = sphi %s817_s15, %s981_s15  }
   0x3   : > { %s61_s20 = ssub.s32 %s785_s17, %s836_s19  ;;  %s64_s21 = sadd.s32 1, %s781_s16 }
   0x4   : > { %p62_p0 = scmp.eq.s32.totalorder %s61_s20, 0  ;;  %p71_p1 = scmp.ne.s32.totalorder %s781_s16, %s777_s15 }
   0x5   : > { %p72_p2 = scmp.eq.s32.totalorder %s785_s17, 0  ;;  %p127_p3 = scmp.eq.s32.totalorder %s833_s18, 1 }
   0x6   : > { %s846_s22 = scalar_select %p62_p0, %s781_s16, %s64_s21  }
   0x7   : > { %p848_p4 = por %p72_p2, %p71_p1  ;;  %p852_p5 = por %p127_p3, %p71_p1 }
   0x8   : > { %p660_p6 = scmp.ge.s32.totalorder %s785_s17, 1  ;;  %p140_p7 = scmp.lt.s32.totalorder %s785_s17, 3 }
   0x9   : > { %s978_s24 = scalar_select %p852_p5, 1, 0 }
   0xa   : > { %p711_p8 = scmp.eq.s32.totalorder %s833_s18, 0  ;;  %p859_p9 = pnand %p660_p6, %p140_p7 }
   0xb   : > { %s153_s28 = sshll.u32 %s972_s0, 4  ;;  %s154_s28 = int_to_ptr.vmem [resolvable:$true] %s153_s28 }
   0xc   : > { %p707_p10 = pneg %p859_p9  ;;  %s744_s29 = scalar_lea.vmem %s154_s28, 16 }
   0xd   : > { %p745_p12 = scmp.ne.s32.totalorder %s154_s28, %s744_s29  ;;  %p752_p2 = scmp.lt.s32.totalorder %s154_s28, %s154_s28 }
   0xe   : > { %p708_p11 = pnand %p711_p8, %p707_p10  ;;  %p753_p3 = scmp.lt.s32.totalorder %s744_s29, %s744_s29 }
  0x10   : > { %p746_p13 = pneg %p708_p11  ;;  %p754_p6 = por %p753_p3, %p752_p2 }
  0x12   : > { %p747_p0 = pnand %p746_p13, %p745_p12 }
  0x14   : > { %p748_p1 = pneg %p747_p0 }
  0x16   : > { %p755_p7 = pnand %p754_p6, %p748_p1 }
  0x18   : > { %758 = shalt.err (!%p755_p7)
}
  0x19   : > { %s787_s30 = smov [#allocation2]   ;;  %p662_p5 = scmp.ge.s32.totalorder %s785_s17, 2 }
  0x1a   : > { %710 = dma.vmem_to_smem (!%p708_p11), %s154_s28, 16, %s787_s30, [#allocation3]  }
  0x1b   : > { %163 = sbr.rel (%p662_p5) target bundleno = 48 (0x30), region = 24 }
  0x22   : > { %166 = sbr.rel (!%p848_p4) target bundleno = 41 (0x29), region = 28  ;;  %s168_s5 = sand.u32 (%p848_p4), 1, %s781_s16  }
  0x23   : > { %s663_s6 = sshll.u32 (%p848_p4), %s785_s17, 3  ;;  %s700_s7 = smul.u32 (%p848_p4), 40, %s168_s5 }
  0x24   : > { %s172_s10 = scalar_lea.vmem (%p848_p4), %s974_s2, %s663_s6 }
  0x25   : > { %v208_v0 = vld [vmem:[%s172_s10] sm:$0xff] (%p848_p4)  ;;  %v210_v1 = vld [vmem:[%s172_s10 + $0x10] sm:$0xff] (%p848_p4)  ;;  %s170_s11 = scalar_lea.vmem (%p848_p4), [#allocation4], %s700_s7 }
  0x26   : > { %v212_v2 = vld [vmem:[%s172_s10 + $0x20] sm:$0xff] (%p848_p4)  ;;  %v214_v3 = vld [vmem:[%s172_s10 + $0x30] sm:$0xff] (%p848_p4)  ;;  %209 = vst [vmem:[%s170_s11] sm:$0xff] (%p848_p4), %v208_v0  ;;  %211 = vst [vmem:[%s170_s11 + $0x8] sm:$0xff] (%p848_p4), %v210_v1 }
  0x27   : > { %v216_v4 = vld [vmem:[%s172_s10 + $0x40] sm:$0xff] (%p848_p4)  ;;  %213 = vst [vmem:[%s170_s11 + $0x10] sm:$0xff] (%p848_p4), %v212_v2  ;;  %215 = vst [vmem:[%s170_s11 + $0x18] sm:$0xff] (%p848_p4), %v214_v3 }
  0x28   : > { %217 = vst [vmem:[%s170_s11 + $0x20] sm:$0xff] (%p848_p4), %v216_v4 }
  0x29 PF: > { %223 = sbr.rel (!%p848_p4) target bundleno = 48 (0x30), region = 66  ;;  %s225_s12 = sand.u32 (%p848_p4), 1, %s781_s16  }
  0x2a   : > { %s664_s13 = sshll.u32 (%p848_p4), %s785_s17, 3  ;;  %s701_s14 = smul.u32 (%p848_p4), 40, %s225_s12 }
  0x2b   : > { %s229_s26 = scalar_lea.vmem (%p848_p4), %s975_s3, %s664_s13 }
  0x2c   : > { %v265_v5 = vld [vmem:[%s229_s26] sm:$0xff] (%p848_p4)  ;;  %v267_v6 = vld [vmem:[%s229_s26 + $0x10] sm:$0xff] (%p848_p4)  ;;  %s227_s27 = scalar_lea.vmem (%p848_p4), [#allocation5], %s701_s14 }
  0x2d   : > { %v269_v7 = vld [vmem:[%s229_s26 + $0x20] sm:$0xff] (%p848_p4)  ;;  %v271_v8 = vld [vmem:[%s229_s26 + $0x30] sm:$0xff] (%p848_p4)  ;;  %266 = vst [vmem:[%s227_s27] sm:$0xff] (%p848_p4), %v265_v5  ;;  %268 = vst [vmem:[%s227_s27 + $0x8] sm:$0xff] (%p848_p4), %v267_v6 }
  0x2e   : > { %v273_v9 = vld [vmem:[%s229_s26 + $0x40] sm:$0xff] (%p848_p4)  ;;  %270 = vst [vmem:[%s227_s27 + $0x10] sm:$0xff] (%p848_p4), %v269_v7  ;;  %272 = vst [vmem:[%s227_s27 + $0x18] sm:$0xff] (%p848_p4), %v271_v8 }
  0x2f   : > { %274 = vst [vmem:[%s227_s27 + $0x20] sm:$0xff] (%p848_p4), %v273_v9 }
  0x30 PF: > { %283 = sbr.rel (%p859_p9) target bundleno = 431 (0x1af), region = 104 }
  0x37   : > { %772 = dma.done.wait (%p711_p8), [#allocation3], 16  }
  0x38   : > { %774 = vsyncadd (%p711_p8), [#allocation3], 4294967280  ;;  %s290_s17 = sand.u32 1, %s777_s15  }
  0x39   : > { %s702_s23 = smul.u32 40, %s290_s17 }
  0x3b   : > { %s894_s28 = scalar_lea.vmem [#allocation4], %s702_s23  ;;  %s896_s29 = scalar_lea.vmem [#allocation5], %s702_s23 }
  0x3c   : > { %303 = sfence }
  0x3d   : > { %s674_s25 = sshll.u32 %s833_s18, 3  ;;  %v358_v10 = vld [vmem:[%s973_s1] sm:$0xff]  ;;  %v359_v11 = vld [vmem:[%s973_s1 + $0x8] sm:$0xff]  ;;  %v788_v12 = vmov 0.0   ;;  %vm789_vm0 = vmmov 0   ;;  %s327_s11 = sld [smem:[#allocation2]]  ;;  %v430_v45 = vlaneseq }
  0x3e   : > { %s477_s10 = scalar_lea.vmem %s973_s1, %s674_s25  ;;  %684 = vmatprep.subr.bf16.mxu0 %v788_v12  ;;  %698 = vmatprep.subr.bf16.mxu1 %v788_v12  ;;  %v360_v13 = vpack.c.bf16 %v359_v11, %v358_v10  ;;  %s668_s12 = sld [smem:[#allocation2 + $0x1]]  ;;  %v331_v15 = vld [vmem:[%s896_s29] sm:$0xff]  ;;  %v332_v16 = vld [vmem:[%s896_s29 + $0x8] sm:$0xff]  ;;  %v342_v17 = vld [vmem:[%s894_s28] sm:$0xff]  ;;  %vm364_vm1 = vcmask 130048  }
  0x3f   : > { %v910_v14 = vld [vmem:[%s477_s10] sm:$0xff]  ;;  %686 = vmatprep.mubr.msk.bf16.mxu0 %vm789_vm0, %v788_v12  ;;  %690 = vmatprep.mubr.msk.bf16.mxu1 %vm789_vm0, %v788_v12  ;;  %s790_s13 = smov 1   ;;  %v343_v18 = vld [vmem:[%s894_s28 + $0x8] sm:$0xff]  ;;  %s791_s14 = smov 127   ;;  %v344_v21 = vld [vmem:[%s894_s28 + $0x10] sm:$0xff]  ;;  %v431_v46 = vand.u32 127, %v430_v45 }
  0x40   : > { %479 = vrot.lane.b32.xlu0 %v910_v14, %s790_s13  ;;  %685 = vmatpush3.bf16.msra.mxu0 %v360_v13  ;;  %v333_v19 = vld [vmem:[%s896_s29 + $0x10] sm:$0xff]  ;;  %v334_v20 = vld [vmem:[%s896_s29 + $0x18] sm:$0xff]  ;;  %v345_v22 = vld [vmem:[%s894_s28 + $0x18] sm:$0xff]  ;;  %v482_v49 = vmul.f32 2.0, %v910_v14  ;;  %s669_s20 = sld [smem:[#allocation2 + $0x2]]  ;;  %s670_s21 = sld [smem:[#allocation2 + $0x3]] }
  0x41   : > { %699 = vmatpush3.bf16.msra.mxu1 %v360_v13  ;;  %v335_v29 = vld [vmem:[%s896_s29 + $0x20] sm:$0xff]  ;;  %v346_v30 = vld [vmem:[%s894_s28 + $0x20] sm:$0xff]  ;;  %v436_v47 = vand.u32 63, %v431_v46  ;;  %s667_s26 = sshll.u32 %s290_s17, 4  ;;  %p980_p4 = scmp.ne.s32.totalorder %s978_s24, 0 }
  0x42   : > { %s325_s27 = scalar_lea.vmem [#allocation6], %s667_s26  ;;  %s533_s23 = scalar_lea.vmem (%p980_p4), %s976_s4, %s674_s25 }
  0x43   : > { %v347_v24 = vstv %s327_s11  ;;  %v929_v48 = vadd.s32 4294967295, %v436_v47  ;;  %v933_v50 = vadd.s32 1, %v436_v47 }
  0x44   : > { %485 = vrot.lane.b32.xlu0 %v910_v14, %s791_s14  ;;  %v336_v23 = vstv %s668_s12  ;;  %v348_v27 = vmul.f32 %v347_v24, %v342_v17  ;;  %v349_v28 = vmul.f32 %v347_v24, %v343_v18  ;;  %v350_v33 = vmul.f32 %v347_v24, %v344_v21 }
  0x45   : > { %v337_v25 = vmul.f32 %v336_v23, %v331_v15  ;;  %v338_v26 = vmul.f32 %v336_v23, %v332_v16  ;;  %v339_v31 = vmul.f32 %v336_v23, %v333_v19  ;;  %v340_v32 = vmul.f32 %v336_v23, %v334_v20 }
  0x46   : > { %v351_v34 = vmul.f32 %v347_v24, %v345_v22  ;;  %v341_v39 = vmul.f32 %v336_v23, %v335_v29  ;;  %v352_v40 = vmul.f32 %v347_v24, %v346_v30  ;;  %vm448_vm2 = vcmp.ge.s32.totalorder %v929_v48, 0 }
  0x47   : > { %v353_v35 = vadd.f32 %v348_v27, %v337_v25  ;;  %v354_v36 = vadd.f32 %v349_v28, %v338_v26  ;;  %v355_v37 = vadd.f32 %v350_v33, %v339_v31  ;;  %vm460_vm3 = vcmp.lt.s32.totalorder %v933_v50, 64 }
  0x48   : > { %v356_v38 = vadd.f32 %v351_v34, %v340_v32  ;;  %v357_v43 = vadd.f32 %v352_v40, %v341_v39  ;;  %v509_v29 = vstv %s669_s20 }
  0x49   : > { %v361_v41 = vpack.c.bf16 %v354_v36, %v353_v35  ;;  %v510_v32 = vmul.f32 %v509_v29, %v910_v14  ;;  %v514_v36 = vstv %s670_s21 }
  0x4a   : > { %v362_v42 = vpack.c.bf16 %v356_v38, %v355_v37  ;;  %v363_v44 = vpack.c.bf16 %v357_v43, %v357_v43 }
  0x4b   : > { %687 = vmatmul.mubr.msk.bf16.vlgmr.msra.gmra.mrb[0].mxu0 %vm364_vm1, %v361_v41 }
  0x4c   : > { %691 = vmatmul.mubr.msk.bf16.vlgmr.msra.gmra.mrb[0].mxu1 %vm364_vm1, %v362_v42 }
  0x4d   : > { %694 = vmatprep.mubr.msk.bf16.mxu1 %vm789_vm0, %v788_v12 }
  0x54   : > { %695 = vmatmul.mubr.msk.bf16.gmra.mrb[4].mxu1 %vm364_vm1, %v363_v44 }
  0xb2   : > { %v480_v51 = vpop.permute.xlu0 %479 }
  0xb3   : > { %v481_v52 = vsel %vm448_vm2, %v480_v51, 0.0 }
  0xb4   : > { %v483_v53 = vadd.f32 %v482_v49, %v481_v52 }
  0xb6   : > { %v484_v54 = vmul.f32 0.33333334, %v483_v53  ;;  %v486_v55 = vpop.permute.xlu0 %485 }
  0xb7   : > { %v487_v56 = vsel %vm460_vm3, %v486_v55, 0.0 }
  0xb8   : > { %v488_v57 = vadd.f32 %v487_v56, %v482_v49  ;;  %490 = vadd.xlane.f32.xlu1 %v484_v54  ;;  %v495_v58 = vmul.f32 %v484_v54, %v484_v54 }
  0xba   : > { %v489_v59 = vmul.f32 0.33333334, %v488_v57  ;;  %496 = vadd.xlane.f32.xlu0 %v495_v58 }
  0xbc   : > { %492 = vadd.xlane.f32.xlu1 %v489_v59  ;;  %v498_v60 = vmul.f32 %v489_v59, %v489_v59 }
  0xc0   : > { %499 = vadd.xlane.f32.xlu1 %v498_v60 }
 0x11e   : > { %v408_v61 = vpop.f32.mrb[0].mxu0 }
 0x11f   : > { %v416_v62 = vpop.f32.mrb[0].mxu1  ;;  %466 = vrot.lane.b32.xlu1 %v408_v61, %s790_s13  ;;  %v688_v63 = vpop.f32.mrb[1].mxu0 }
 0x120   : > { %v692_v0 = vpop.f32.mrb[1].mxu1  ;;  %v411_v1 = vpop.f32.mrb[2].mxu0 }
 0x121   : > { %v444_v2 = vadd.f32 %v411_v1, %v408_v61  ;;  %v469_v3 = vadd.f32 %v416_v62, %v411_v1  ;;  %v419_v4 = vpop.f32.mrb[2].mxu1  ;;  %v689_v5 = vpop.f32.mrb[3].mxu0 }
 0x122   : > { %v454_v6 = vadd.f32 %v419_v4, %v416_v62  ;;  %v693_v7 = vpop.f32.mrb[3].mxu1 }
 0x123   : > { %445 = vrot.lane.b32.xlu1 %v444_v2, %s790_s13 }
 0x127   : > { %v424_v8 = vpop.f32.mrb[4].mxu1 }
 0x128   : > { %v471_v9 = vadd.f32 %v424_v8, %v419_v4  ;;  %v696_v10 = vpop.f32.mrb[5].mxu1  ;;  %456 = vrot.lane.b32.xlu1 %v424_v8, %s791_s14 }
 0x129   : > { %v427_v11 = vpop.f32.mrb[6].mxu1 }
 0x12a   : > { %v697_v12 = vpop.f32.mrb[7].mxu1 }
 0x12c   : > { %472 = vrot.lane.b32.xlu1 %v471_v9, %s791_s14 }
 0x145   : > { %v491_v13 = vpop.xlane.xlu1 %490 }
 0x147   : > { %v497_v17 = vpop.xlane.xlu0 %496 }
 0x149   : > { %v493_v15 = vpop.xlane.xlu1 %492 }
 0x14a   : > { %v494_v18 = vadd.f32 %v493_v15, %v491_v13 }
 0x14c   : > { %v503_v20 = vmul.f32 0.00390625, %v494_v18 }
 0x14d   : > { %v500_v16 = vpop.xlane.xlu1 %499 }
 0x14e   : > { %v501_v19 = vadd.f32 %v500_v16, %v497_v17  ;;  %v505_v21 = vmul.f32 %v503_v20, %v503_v20  ;;  %v512_v30 = vsub.f32 %v484_v54, %v503_v20  ;;  %v518_v38 = vsub.f32 %v489_v59, %v503_v20 }
 0x150   : > { %v504_v22 = vmul.f32 0.00390625, %v501_v19 }
 0x152   : > { %v506_v23 = vsub.f32 %v504_v22, %v505_v21 }
 0x154   : > { %v507_v24 = vadd.f32 1e-05, %v506_v23 }
 0x156   : > { %742 = vrsqrt.f32 %v507_v24 }
 0x160   : > { %v743_v27 = vpop.eup %742 }
 0x161   : > { %v513_v33 = vmul.f32 %v743_v27, %v512_v30  ;;  %v519_v43 = vmul.f32 %v743_v27, %v518_v38 }
 0x163   : > { %v515_v41 = vmul.f32 %v514_v36, %v513_v33  ;;  %v520_v47 = vmul.f32 %v519_v43, %v514_v36 }
 0x191   : > { %v467_v25 = vpop.permute.xlu1 %466 }
 0x192   : > { %v468_v35 = vsel %vm448_vm2, %v467_v25, 0.0 }
 0x193   : > { %v470_v40 = vadd.f32 %v469_v3, %v468_v35 }
 0x195   : > { %v446_v26 = vpop.permute.xlu1 %445 }
 0x196   : > { %v453_v28 = vsel %vm448_vm2, %v446_v26, 0.0 }
 0x197   : > { %v455_v31 = vadd.f32 %v454_v6, %v453_v28 }
 0x19a   : > { %v457_v34 = vpop.permute.xlu1 %456 }
 0x19b   : > { %v464_v37 = vsel %vm460_vm3, %v457_v34, 0.0 }
 0x19c   : > { %v465_v39 = vadd.f32 %v464_v37, %v455_v31 }
 0x19e   : > { %v511_v42 = vadd.f32 %v510_v32, %v465_v39  ;;  %v473_v44 = vpop.permute.xlu1 %472 }
 0x19f   : > { %v474_v14 = vsel %vm460_vm3, %v473_v44, 0.0 }
 0x1a0   : > { %v516_v45 = vadd.f32 %v515_v41, %v511_v42  ;;  %v475_v46 = vadd.f32 %v474_v14, %v470_v40  ;;  %531 = sbr.rel (!%p980_p4) target bundleno = 431 (0x1af), region = 120 }
 0x1a2   : > { %522 = vst [vmem:[%s325_s27] sm:$0xff] %v516_v45  ;;  %v517_v48 = vadd.f32 %v510_v32, %v475_v46 }
 0x1a4   : > { %v521_v49 = vadd.f32 %v520_v47, %v517_v48 }
 0x1a6   : > { %675 = vst [vmem:[%s325_s27 + $0x8] sm:$0xff] %v521_v49 }
 0x1a9   : > { %v563_v51 = vld [vmem:[%s325_s27] sm:$0xff] }
 0x1aa   : > { %564 = vst [vmem:[%s533_s23] sm:$0xff] %v563_v51 }
 0x1ad   : > { %v565_v50 = vld [vmem:[%s325_s27 + $0x8] sm:$0xff] }
 0x1ae   : > { %566 = vst [vmem:[%s533_s23 + $0x10] sm:$0xff] %v565_v50 }
 0x1af PF: > { %p12_p5 = scmp.ge.s32.totalorder %s836_s19, 4   ;;  %s981_s15 = smov %s781_s16 }
 0x1b0   : > { %s982_s16 = smov %s846_s22  ;;  %s983_s17 = smov %s836_s19 }
 0x1b1   :  { %14 = sbr.rel (!%p12_p5) target bundleno = 2 (0x2), region = 200 }
 0x1b8   :  { %582 = vsyncpa [#allocation3], 1 }
 0x1b9   :  { %584 = vsyncpa [#allocation3 + $0x1], 1 }

</bundles_post_ra>
